<compile_context>
chip_gen: v5e
topology: v5e:2x2
jax: 0.10.0
libtpu: 0.0.40
codegen_flags: <defaults>
</compile_context>

<pallas_src>
import functools

import jax
import jax.numpy as jnp
from jax import lax
from jax.experimental import pallas as pl
from jax.experimental.pallas import tpu as pltpu

_SCALE = 4    # stands in for 256
_BASE = 64    # stands in for 262144
_EXP = 2      # stands in for 8
_MUL = 4      # stands in for 256


# ---------------------------------------------------------------------------
# Fused kernel: per-tile gathers for x825 / f790 / g580 plus the tiny v963.
# Every output block is distinct per grid step, so the single grid axis is
# safely "parallel" (v7x megacore shards it across both TensorCores).
# ---------------------------------------------------------------------------
def _fused_kernel(k_ref, z_ref, cols_ref, v890t_ref, flat_ref,
                  v963_ref, x825_ref, f790_ref, g580_ref, *, B, R, A, CL):
    T = k_ref.shape[1]
    RA = R * A
    ra_shift = RA.bit_length() - 1

    k = k_ref[...]          # (1, T) int32 in [0, B*R*A)
    z = z_ref[...]          # (1, T) int32 in [0, A)
    flat = flat_ref[...]    # (B, CL) f32  (v759 flattened, resident)

    # ---- v963 = v759.view(B,1,-1)[:, :, v890] : tiny one-hot MXU gather ----
    # Recomputed per tile (one (B,CL)x(CL,R*A) dot, negligible) instead of a
    # separate pallas_call or a pl.when(first-step) scratch init, so the grid
    # stays megacore-parallel and nothing round-trips through HBM.
    cols = cols_ref[...]                                              # (1, RA)
    c_iota = lax.broadcasted_iota(jnp.int32, (CL, RA), 0)
    oh_v = (c_iota == cols).astype(jnp.float32)                       # (CL, RA)
    v963 = jnp.dot(flat, oh_v, preferred_element_type=jnp.float32)    # (B, RA)
    v963_ref[...] = v963

    # ---- x825 = v963.view(-1)[k845] : two-stage VPU gather -----------------
    # Decompose k into (row, col); column gather via a compare-select chain
    # over R*A (no (B*R*A, T) one-hot is ever materialized -> no vreg spills
    # at large TILE_N), then a row select over B.  Work is O((R*A + B) * T).
    row = jnp.right_shift(k, ra_shift)              # k // (R*A)
    col = jnp.bitwise_and(k, jnp.int32(RA - 1))     # k %  (R*A)
    colvals = jnp.zeros((B, T), jnp.float32)
    for j in range(RA):
        colvals = jnp.where(col == j, v963[:, j:j + 1], colvals)
    x = jnp.zeros((1, T), jnp.float32)
    for b in range(B):
        x = jnp.where(row == b, colvals[b:b + 1, :], x)
    x825_ref[...] = x

    # ---- f790 = v963[:, :, k845 (mod R), :] : A small MXU dots -------------
    # TODO(synk): k845 ranges over i808.size(0) which exceeds v963.shape[2];
    # that advanced indexing is out of range in PyTorch.  Indices are reduced
    # modulo R (a power of two) here.
    k_mod = jnp.bitwise_and(k, jnp.int32(R - 1))
    r_iota = lax.broadcasted_iota(jnp.int32, (R, T), 0)
    oh_r = (r_iota == k_mod).astype(jnp.float32)                      # (R, T)
    cl_iota_r = lax.broadcasted_iota(jnp.int32, (CL, R), 0)
    for a in range(A):
        # slab[b, r] = v963[b, r*A + a], built straight from `flat` so no
        # in-kernel transpose/reshape and no wrapper-side (B*A, R) copy.
        oh_a = (cl_iota_r == v890t_ref[a:a + 1, :]).astype(jnp.float32)  # (CL, R)
        slab = jnp.dot(flat, oh_a, preferred_element_type=jnp.float32)   # (B, R)
        f790_ref[a * B:(a + 1) * B, :] = jnp.dot(
            slab, oh_r, preferred_element_type=jnp.float32)              # (B, T)

    # ---- g580 = v890[z842] : int gather, one hoisted one-hot compare -------
    a_iota = lax.broadcasted_iota(jnp.int32, (A, T), 0)
    eqi = (a_iota == z).astype(jnp.int32)                             # (A, T)
    g = jnp.zeros((A, T), jnp.int32)
    for j in range(A):
        g = g + eqi[j:j + 1, :] * v890t_ref[:, j:j + 1]
    g580_ref[...] = g


def _chunk(x, chunks):
    """torch.chunk semantics along dim 0."""
    length = int(x.shape[0])
    size = -(-length // chunks)
    return [x[i * size:min((i + 1) * size, length)]
            for i in range(chunks) if i * size < length]


def model_forward(v890, v759, p985, key):
    B = int(v759.shape[0])                              # t386
    CL = int(v759.shape[1]) * int(v759.shape[2])
    R, A = int(v890.shape[0]), int(v890.shape[1])
    a865 = A
    RA = R * A
    assert R & (R - 1) == 0 and A & (A - 1) == 0, \
        "R, A must be powers of two (in-kernel shift/mask index decomposition)"
    assert A <= R, "g580 row gather needs z842 values < v890.shape[0]"

    c700 = p985 * _SCALE
    if c700 <= 0:
        raise ValueError("p985 must be >= 1: the original module chunks by "
                         "c700 = p985*256 (torch.chunk(chunks=0) is ill-formed).")
    n910 = int(c700 ** _EXP * _MUL
               + c700 * a865 * 1.140143800495577 * 8 / 35.0 + _BASE)
    e411 = p985 * _SCALE

    flat = v759.reshape(B, CL).astype(jnp.float32)
    v890_i = v890.astype(jnp.int32)                     # int32 instead of int64 on TPU
    v890_cols = v890_i.reshape(1, RA)
    v890_t = v890_i.T                                   # (A, R)

    # ---- random indices (torch.randint equivalent), lane-dense -------------
    k_a, k_b = jax.random.split(key)
    k845 = jax.random.randint(k_a, (n910,), 0, B * RA, dtype=jnp.int32)
    z842 = jax.random.randint(k_b, (n910,), 0, A, dtype=jnp.int32)

    # Big tiles amortize the ~0.35us/step pipeline overhead, but keep >=2 grid
    # steps (whenever n910 allows) so the "parallel" axis really shards across
    # both v7x TensorCores.
    TILE_N = 2048
    while TILE_N > 128 and n910 <= TILE_N:
        TILE_N //= 2
    num_tiles = int(pl.cdiv(n910, TILE_N))
    Np = num_tiles * TILE_N
    k845_p = jnp.pad(k845, (0, Np - n910)).reshape(1, Np)
    z842_p = jnp.pad(z842, (0, Np - n910)).reshape(1, Np)

    AB = A * B
    # True per-step block footprint with generous slack, capped well below
    # v7x's 64 MiB VMEM (review: keep the request <= 48 MiB).
    tile_io_bytes = (4 * TILE_N * (2 + 1 + AB + A)
                     + 4 * (RA + A * R + B * CL + B * RA))
    vmem_limit = int(min(32 * 2 ** 20, max(8 * 2 ** 20, 8 * tile_io_bytes)))

    flops = num_tiles * (2 * B * CL * RA
                         + A * (2 * B * CL * R + 2 * B * R * TILE_N))
    bytes_accessed = (4 * Np * (2 + 1 + AB + A)
                      + 4 * (RA + A * R + B * CL)
                      + 4 * num_tiles * B * RA)

    # NOTE: the three grid-invariant inputs stay resident (constant block
    # index).  pipeline_mode=pl.Buffered(1) would halve their footprint, but
    # they total <1 KiB so it is not worth the extra API surface here.
    v963_tiles, x825_2d, f790_ab, g580_t = pl.pallas_call(
        functools.partial(_fused_kernel, B=B, R=R, A=A, CL=CL),
        out_shape=(
            jax.ShapeDtypeStruct((num_tiles, B, RA), jnp.float32),   # v963 per tile
            jax.ShapeDtypeStruct((1, Np), jnp.float32),              # x825 (lane-dense)
            jax.ShapeDtypeStruct((AB, Np), jnp.float32),             # f790, rows a*B+b
            jax.ShapeDtypeStruct((A, Np), jnp.int32),                # g580 (A, N)
        ),
        grid=(num_tiles,),
        in_specs=[
            pl.BlockSpec((1, TILE_N), lambda i: (0, i)),     # k845
            pl.BlockSpec((1, TILE_N), lambda i: (0, i)),     # z842
            pl.BlockSpec((1, RA), lambda i: (0, 0)),         # v890 flat (gather cols)
            pl.BlockSpec((A, R), lambda i: (0, 0)),          # v890.T
            pl.BlockSpec((B, CL), lambda i: (0, 0)),         # v759 flat
        ],
        out_specs=(
            pl.BlockSpec((None, B, RA), lambda i: (i, 0, 0)),
            pl.BlockSpec((1, TILE_N), lambda i: (0, i)),
            pl.BlockSpec((AB, TILE_N), lambda i: (0, i)),
            pl.BlockSpec((A, TILE_N), lambda i: (0, i)),
        ),
        compiler_params=pltpu.CompilerParams(
            dimension_semantics=("parallel",),
            vmem_limit_bytes=vmem_limit),
        cost_estimate=pl.CostEstimate(flops=flops, transcendentals=0,
                                      bytes_accessed=bytes_accessed),
    )(k845_p, z842_p, v890_cols, v890_t, flat)

    # ---- wrapper glue (static shape logic / reshapes / concats) ------------
    v963_2d = v963_tiles[0]                                        # (B, R*A)
    x825 = x825_2d[0, :n910]
    # TODO(synk): the (A*B, N) kernel layout is lane-dense (fast stores); this
    # transpose exists only to match PyTorch's (B, 1, n910, A) return layout.
    f790 = (f790_ab[:, :n910].reshape(A, B, n910)
            .transpose(1, 2, 0).reshape(B, 1, n910, A))
    g580 = g580_t[:, :n910].T                                      # (n910, A)

    v963 = v963_2d.reshape(B, 1, R, A)
    o221 = bool(v963.shape[1] > n910)                  # static shape compare
    f261 = jnp.full((B, v963.shape[1], 1), o221, dtype=jnp.bool_)
    v323 = jnp.concatenate([v963.reshape(-1), x825], axis=0)
    o572 = bool(v890.shape[0] > n910)                  # static shape compare
    # TODO(synk): j813 = y461[z842]; y461 = tile(o572, (c700,)) so every element
    # equals o572 and the gather is constant (PyTorch would additionally raise
    # when a865 > c700; that out-of-range case is not reproduced here).
    j813 = jnp.full((n910,), o572, dtype=jnp.bool_)
    e688 = jnp.concatenate([v323, v963.reshape(-1)], axis=0)
    m818 = _chunk(e688, c700)
    # TODO(synk): original n855 cats a 3-D tensor with a *tuple* of 1-D chunks
    # (ill-formed in PyTorch); both pieces are flattened and concatenated here.
    rep = jnp.broadcast_to(g580.astype(jnp.float32)[None],
                           (e411, n910, A)).reshape(-1)
    n855 = jnp.concatenate([rep, jnp.concatenate(m818, axis=0)], axis=0)
    return f261, f790, j813, n855


if __name__ == "__main__":
    key = jax.random.PRNGKey(0)
    k1, k2, k3 = jax.random.split(key, 3)
    # small shapes consistent with the forward: v759 (B, C, L); v890 2-D (uses shape[1])
    v759 = jax.random.normal(k1, (2, 4, 10), dtype=jnp.float32)
    v890 = jax.random.randint(k2, (4, 4), 0, 4 * 10, dtype=jnp.int32)
    outs = model_forward(v890, v759, p985=1, key=k3)
    jax.block_until_ready(outs)
    print("KERNEL_OK")
</pallas_src>

<mosaic_0001>
module attributes {stable_mosaic.version = 11 : i64} {
  func.func @_fused_kernel(%arg0: i32, %arg1: memref<1x128xi32, #tpu.memory_space<vmem>>, %arg2: memref<1x128xi32, #tpu.memory_space<vmem>>, %arg3: memref<1x16xi32, #tpu.memory_space<vmem>>, %arg4: memref<4x4xi32, #tpu.memory_space<vmem>>, %arg5: memref<2x40xf32, #tpu.memory_space<vmem>>, %arg6: memref<1x2x16xf32, #tpu.memory_space<vmem>>, %arg7: memref<1x128xf32, #tpu.memory_space<vmem>>, %arg8: memref<8x128xf32, #tpu.memory_space<vmem>>, %arg9: memref<4x128xi32, #tpu.memory_space<vmem>>) attributes {dimension_semantics = [#tpu.dimension_semantics<parallel>], iteration_bounds = array<i64: 2>, scalar_prefetch = 0 : i64, scratch_operands = 0 : i64, tpu.core_type = #tpu.core_type<tc>, window_params = [{transform_indices = @transform_0, window_bounds = array<i64: 1, 128>}, {transform_indices = @transform_1, window_bounds = array<i64: 1, 128>}, {pipeline_mode = #tpu.pipeline_mode<synchronous>, transform_indices = @transform_2, window_bounds = array<i64: 1, 16>}, {pipeline_mode = #tpu.pipeline_mode<synchronous>, transform_indices = @transform_3, window_bounds = array<i64: 4, 4>}, {pipeline_mode = #tpu.pipeline_mode<synchronous>, transform_indices = @transform_4, window_bounds = array<i64: 2, 40>}, {transform_indices = @transform_5, window_bounds = array<i64: 1, 2, 16>}, {transform_indices = @transform_6, window_bounds = array<i64: 1, 128>}, {transform_indices = @transform_7, window_bounds = array<i64: 8, 128>}, {transform_indices = @transform_8, window_bounds = array<i64: 4, 128>}]} {
    %c0 = arith.constant 0 : index
    %c0_0 = arith.constant 0 : index
    %0 = vector.load %arg1[%c0, %c0_0] : memref<1x128xi32, #tpu.memory_space<vmem>>, vector<1x128xi32>
    %c0_1 = arith.constant 0 : index
    %c0_2 = arith.constant 0 : index
    %1 = vector.load %arg2[%c0_1, %c0_2] : memref<1x128xi32, #tpu.memory_space<vmem>>, vector<1x128xi32>
    %c0_3 = arith.constant 0 : index
    %c0_4 = arith.constant 0 : index
    %2 = vector.load %arg5[%c0_3, %c0_4] : memref<2x40xf32, #tpu.memory_space<vmem>>, vector<2x40xf32>
    %c0_5 = arith.constant 0 : index
    %c0_6 = arith.constant 0 : index
    %3 = vector.load %arg3[%c0_5, %c0_6] : memref<1x16xi32, #tpu.memory_space<vmem>>, vector<1x16xi32>
    %4 = tpu.iota {dimensions = array<i32: 0>} : vector<40x16xi32>
    %5 = vector.broadcast %3 : vector<1x16xi32> to vector<40x16xi32>
    %6 = arith.cmpi eq, %4, %5 : vector<40x16xi32>
    %7 = arith.extui %6 : vector<40x16xi1> to vector<40x16xi32>
    %8 = arith.sitofp %7 : vector<40x16xi32> to vector<40x16xf32>
    %cst = arith.constant dense<0.000000e+00> : vector<2x16xf32>
    %9 = tpu.matmul %2, %8, %cst {dimension_numbers = #tpu.dot_dimension_numbers<[1], [0], [0], [1], [0, 0, 1, 1], [], []>} : vector<2x40xf32>, vector<40x16xf32>, vector<2x16xf32> -> vector<2x16xf32>
    %c0_7 = arith.constant 0 : index
    %c0_8 = arith.constant 0 : index
    %c0_9 = arith.constant 0 : index
    %10 = vector.load %arg6[%c0_7, %c0_8, %c0_9] : memref<1x2x16xf32, #tpu.memory_space<vmem>>, vector<1x2x16xf32>
    %11 = vector.shape_cast %10 : vector<1x2x16xf32> to vector<2x16xf32>
    %12 = vector.shape_cast %9 : vector<2x16xf32> to vector<1x2x16xf32>
    tpu.vector_store %arg6[%c0_7, %c0_8, %c0_9], %12 {strides = array<i32>} : memref<1x2x16xf32, #tpu.memory_space<vmem>>, vector<1x2x16xf32>,
    %c4_i32 = arith.constant 4 : i32
    %13 = vector.broadcast %c4_i32 : i32 to vector<1x128xi32>
    %14 = arith.shrsi %0, %13 : vector<1x128xi32>
    %c15_i32 = arith.constant 15 : i32
    %15 = vector.broadcast %c15_i32 : i32 to vector<1x128xi32>
    %16 = arith.andi %0, %15 : vector<1x128xi32>
    %cst_10 = arith.constant 0.000000e+00 : f32
    %17 = vector.broadcast %cst_10 : f32 to vector<2x128xf32>
    %c0_i32 = arith.constant 0 : i32
    %18 = vector.broadcast %c0_i32 : i32 to vector<1x128xi32>
    %19 = arith.cmpi eq, %16, %18 : vector<1x128xi32>
    %20 = vector.extract_strided_slice %9 {offsets = [0, 0], sizes = [2, 1], strides = [1, 1]} : vector<2x16xf32> to vector<2x1xf32>
    %21 = vector.shape_cast %19 : vector<1x128xi1> to vector<1x128xi1>
    %22 = vector.broadcast %21 : vector<1x128xi1> to vector<2x128xi1>
    %23 = vector.shape_cast %20 : vector<2x1xf32> to vector<2x1xf32>
    %24 = vector.broadcast %23 : vector<2x1xf32> to vector<2x128xf32>
    %25 = arith.select %22, %24, %17 : vector<2x128xi1>, vector<2x128xf32>
    %c1_i32 = arith.constant 1 : i32
    %26 = vector.broadcast %c1_i32 : i32 to vector<1x128xi32>
    %27 = arith.cmpi eq, %16, %26 : vector<1x128xi32>
    %28 = vector.extract_strided_slice %9 {offsets = [0, 1], sizes = [2, 1], strides = [1, 1]} : vector<2x16xf32> to vector<2x1xf32>
    %29 = vector.shape_cast %27 : vector<1x128xi1> to vector<1x128xi1>
    %30 = vector.broadcast %29 : vector<1x128xi1> to vector<2x128xi1>
    %31 = vector.shape_cast %28 : vector<2x1xf32> to vector<2x1xf32>
    %32 = vector.broadcast %31 : vector<2x1xf32> to vector<2x128xf32>
    %33 = arith.select %30, %32, %25 : vector<2x128xi1>, vector<2x128xf32>
    %c2_i32 = arith.constant 2 : i32
    %34 = vector.broadcast %c2_i32 : i32 to vector<1x128xi32>
    %35 = arith.cmpi eq, %16, %34 : vector<1x128xi32>
    %36 = vector.extract_strided_slice %9 {offsets = [0, 2], sizes = [2, 1], strides = [1, 1]} : vector<2x16xf32> to vector<2x1xf32>
    %37 = vector.shape_cast %35 : vector<1x128xi1> to vector<1x128xi1>
    %38 = vector.broadcast %37 : vector<1x128xi1> to vector<2x128xi1>
    %39 = vector.shape_cast %36 : vector<2x1xf32> to vector<2x1xf32>
    %40 = vector.broadcast %39 : vector<2x1xf32> to vector<2x128xf32>
    %41 = arith.select %38, %40, %33 : vector<2x128xi1>, vector<2x128xf32>
    %c3_i32 = arith.constant 3 : i32
    %42 = vector.broadcast %c3_i32 : i32 to vector<1x128xi32>
    %43 = arith.cmpi eq, %16, %42 : vector<1x128xi32>
    %44 = vector.extract_strided_slice %9 {offsets = [0, 3], sizes = [2, 1], strides = [1, 1]} : vector<2x16xf32> to vector<2x1xf32>
    %45 = vector.shape_cast %43 : vector<1x128xi1> to vector<1x128xi1>
    %46 = vector.broadcast %45 : vector<1x128xi1> to vector<2x128xi1>
    %47 = vector.shape_cast %44 : vector<2x1xf32> to vector<2x1xf32>
    %48 = vector.broadcast %47 : vector<2x1xf32> to vector<2x128xf32>
    %49 = arith.select %46, %48, %41 : vector<2x128xi1>, vector<2x128xf32>
    %c4_i32_11 = arith.constant 4 : i32
    %50 = vector.broadcast %c4_i32_11 : i32 to vector<1x128xi32>
    %51 = arith.cmpi eq, %16, %50 : vector<1x128xi32>
    %52 = vector.extract_strided_slice %9 {offsets = [0, 4], sizes = [2, 1], strides = [1, 1]} : vector<2x16xf32> to vector<2x1xf32>
    %53 = vector.shape_cast %51 : vector<1x128xi1> to vector<1x128xi1>
    %54 = vector.broadcast %53 : vector<1x128xi1> to vector<2x128xi1>
    %55 = vector.shape_cast %52 : vector<2x1xf32> to vector<2x1xf32>
    %56 = vector.broadcast %55 : vector<2x1xf32> to vector<2x128xf32>
    %57 = arith.select %54, %56, %49 : vector<2x128xi1>, vector<2x128xf32>
    %c5_i32 = arith.constant 5 : i32
    %58 = vector.broadcast %c5_i32 : i32 to vector<1x128xi32>
    %59 = arith.cmpi eq, %16, %58 : vector<1x128xi32>
    %60 = vector.extract_strided_slice %9 {offsets = [0, 5], sizes = [2, 1], strides = [1, 1]} : vector<2x16xf32> to vector<2x1xf32>
    %61 = vector.shape_cast %59 : vector<1x128xi1> to vector<1x128xi1>
    %62 = vector.broadcast %61 : vector<1x128xi1> to vector<2x128xi1>
    %63 = vector.shape_cast %60 : vector<2x1xf32> to vector<2x1xf32>
    %64 = vector.broadcast %63 : vector<2x1xf32> to vector<2x128xf32>
    %65 = arith.select %62, %64, %57 : vector<2x128xi1>, vector<2x128xf32>
    %c6_i32 = arith.constant 6 : i32
    %66 = vector.broadcast %c6_i32 : i32 to vector<1x128xi32>
    %67 = arith.cmpi eq, %16, %66 : vector<1x128xi32>
    %68 = vector.extract_strided_slice %9 {offsets = [0, 6], sizes = [2, 1], strides = [1, 1]} : vector<2x16xf32> to vector<2x1xf32>
    %69 = vector.shape_cast %67 : vector<1x128xi1> to vector<1x128xi1>
    %70 = vector.broadcast %69 : vector<1x128xi1> to vector<2x128xi1>
    %71 = vector.shape_cast %68 : vector<2x1xf32> to vector<2x1xf32>
    %72 = vector.broadcast %71 : vector<2x1xf32> to vector<2x128xf32>
    %73 = arith.select %70, %72, %65 : vector<2x128xi1>, vector<2x128xf32>
    %c7_i32 = arith.constant 7 : i32
    %74 = vector.broadcast %c7_i32 : i32 to vector<1x128xi32>
    %75 = arith.cmpi eq, %16, %74 : vector<1x128xi32>
    %76 = vector.extract_strided_slice %9 {offsets = [0, 7], sizes = [2, 1], strides = [1, 1]} : vector<2x16xf32> to vector<2x1xf32>
    %77 = vector.shape_cast %75 : vector<1x128xi1> to vector<1x128xi1>
    %78 = vector.broadcast %77 : vector<1x128xi1> to vector<2x128xi1>
    %79 = vector.shape_cast %76 : vector<2x1xf32> to vector<2x1xf32>
    %80 = vector.broadcast %79 : vector<2x1xf32> to vector<2x128xf32>
    %81 = arith.select %78, %80, %73 : vector<2x128xi1>, vector<2x128xf32>
    %c8_i32 = arith.constant 8 : i32
    %82 = vector.broadcast %c8_i32 : i32 to vector<1x128xi32>
    %83 = arith.cmpi eq, %16, %82 : vector<1x128xi32>
    %84 = vector.extract_strided_slice %9 {offsets = [0, 8], sizes = [2, 1], strides = [1, 1]} : vector<2x16xf32> to vector<2x1xf32>
    %85 = vector.shape_cast %83 : vector<1x128xi1> to vector<1x128xi1>
    %86 = vector.broadcast %85 : vector<1x128xi1> to vector<2x128xi1>
    %87 = vector.shape_cast %84 : vector<2x1xf32> to vector<2x1xf32>
    %88 = vector.broadcast %87 : vector<2x1xf32> to vector<2x128xf32>
    %89 = arith.select %86, %88, %81 : vector<2x128xi1>, vector<2x128xf32>
    %c9_i32 = arith.constant 9 : i32
    %90 = vector.broadcast %c9_i32 : i32 to vector<1x128xi32>
    %91 = arith.cmpi eq, %16, %90 : vector<1x128xi32>
    %92 = vector.extract_strided_slice %9 {offsets = [0, 9], sizes = [2, 1], strides = [1, 1]} : vector<2x16xf32> to vector<2x1xf32>
    %93 = vector.shape_cast %91 : vector<1x128xi1> to vector<1x128xi1>
    %94 = vector.broadcast %93 : vector<1x128xi1> to vector<2x128xi1>
    %95 = vector.shape_cast %92 : vector<2x1xf32> to vector<2x1xf32>
    %96 = vector.broadcast %95 : vector<2x1xf32> to vector<2x128xf32>
    %97 = arith.select %94, %96, %89 : vector<2x128xi1>, vector<2x128xf32>
    %c10_i32 = arith.constant 10 : i32
    %98 = vector.broadcast %c10_i32 : i32 to vector<1x128xi32>
    %99 = arith.cmpi eq, %16, %98 : vector<1x128xi32>
    %100 = vector.extract_strided_slice %9 {offsets = [0, 10], sizes = [2, 1], strides = [1, 1]} : vector<2x16xf32> to vector<2x1xf32>
    %101 = vector.shape_cast %99 : vector<1x128xi1> to vector<1x128xi1>
    %102 = vector.broadcast %101 : vector<1x128xi1> to vector<2x128xi1>
    %103 = vector.shape_cast %100 : vector<2x1xf32> to vector<2x1xf32>
    %104 = vector.broadcast %103 : vector<2x1xf32> to vector<2x128xf32>
    %105 = arith.select %102, %104, %97 : vector<2x128xi1>, vector<2x128xf32>
    %c11_i32 = arith.constant 11 : i32
    %106 = vector.broadcast %c11_i32 : i32 to vector<1x128xi32>
    %107 = arith.cmpi eq, %16, %106 : vector<1x128xi32>
    %108 = vector.extract_strided_slice %9 {offsets = [0, 11], sizes = [2, 1], strides = [1, 1]} : vector<2x16xf32> to vector<2x1xf32>
    %109 = vector.shape_cast %107 : vector<1x128xi1> to vector<1x128xi1>
    %110 = vector.broadcast %109 : vector<1x128xi1> to vector<2x128xi1>
    %111 = vector.shape_cast %108 : vector<2x1xf32> to vector<2x1xf32>
    %112 = vector.broadcast %111 : vector<2x1xf32> to vector<2x128xf32>
    %113 = arith.select %110, %112, %105 : vector<2x128xi1>, vector<2x128xf32>
    %c12_i32 = arith.constant 12 : i32
    %114 = vector.broadcast %c12_i32 : i32 to vector<1x128xi32>
    %115 = arith.cmpi eq, %16, %114 : vector<1x128xi32>
    %116 = vector.extract_strided_slice %9 {offsets = [0, 12], sizes = [2, 1], strides = [1, 1]} : vector<2x16xf32> to vector<2x1xf32>
    %117 = vector.shape_cast %115 : vector<1x128xi1> to vector<1x128xi1>
    %118 = vector.broadcast %117 : vector<1x128xi1> to vector<2x128xi1>
    %119 = vector.shape_cast %116 : vector<2x1xf32> to vector<2x1xf32>
    %120 = vector.broadcast %119 : vector<2x1xf32> to vector<2x128xf32>
    %121 = arith.select %118, %120, %113 : vector<2x128xi1>, vector<2x128xf32>
    %c13_i32 = arith.constant 13 : i32
    %122 = vector.broadcast %c13_i32 : i32 to vector<1x128xi32>
    %123 = arith.cmpi eq, %16, %122 : vector<1x128xi32>
    %124 = vector.extract_strided_slice %9 {offsets = [0, 13], sizes = [2, 1], strides = [1, 1]} : vector<2x16xf32> to vector<2x1xf32>
    %125 = vector.shape_cast %123 : vector<1x128xi1> to vector<1x128xi1>
    %126 = vector.broadcast %125 : vector<1x128xi1> to vector<2x128xi1>
    %127 = vector.shape_cast %124 : vector<2x1xf32> to vector<2x1xf32>
    %128 = vector.broadcast %127 : vector<2x1xf32> to vector<2x128xf32>
    %129 = arith.select %126, %128, %121 : vector<2x128xi1>, vector<2x128xf32>
    %c14_i32 = arith.constant 14 : i32
    %130 = vector.broadcast %c14_i32 : i32 to vector<1x128xi32>
    %131 = arith.cmpi eq, %16, %130 : vector<1x128xi32>
    %132 = vector.extract_strided_slice %9 {offsets = [0, 14], sizes = [2, 1], strides = [1, 1]} : vector<2x16xf32> to vector<2x1xf32>
    %133 = vector.shape_cast %131 : vector<1x128xi1> to vector<1x128xi1>
    %134 = vector.broadcast %133 : vector<1x128xi1> to vector<2x128xi1>
    %135 = vector.shape_cast %132 : vector<2x1xf32> to vector<2x1xf32>
    %136 = vector.broadcast %135 : vector<2x1xf32> to vector<2x128xf32>
    %137 = arith.select %134, %136, %129 : vector<2x128xi1>, vector<2x128xf32>
    %c15_i32_12 = arith.constant 15 : i32
    %138 = vector.broadcast %c15_i32_12 : i32 to vector<1x128xi32>
    %139 = arith.cmpi eq, %16, %138 : vector<1x128xi32>
    %140 = vector.extract_strided_slice %9 {offsets = [0, 15], sizes = [2, 1], strides = [1, 1]} : vector<2x16xf32> to vector<2x1xf32>
    %141 = vector.shape_cast %139 : vector<1x128xi1> to vector<1x128xi1>
    %142 = vector.broadcast %141 : vector<1x128xi1> to vector<2x128xi1>
    %143 = vector.shape_cast %140 : vector<2x1xf32> to vector<2x1xf32>
    %144 = vector.broadcast %143 : vector<2x1xf32> to vector<2x128xf32>
    %145 = arith.select %142, %144, %137 : vector<2x128xi1>, vector<2x128xf32>
    %cst_13 = arith.constant 0.000000e+00 : f32
    %146 = vector.broadcast %cst_13 : f32 to vector<1x128xf32>
    %c0_i32_14 = arith.constant 0 : i32
    %147 = vector.broadcast %c0_i32_14 : i32 to vector<1x128xi32>
    %148 = arith.cmpi eq, %14, %147 : vector<1x128xi32>
    %149 = vector.extract_strided_slice %145 {offsets = [0, 0], sizes = [1, 128], strides = [1, 1]} : vector<2x128xf32> to vector<1x128xf32>
    %150 = arith.select %148, %149, %146 : vector<1x128xi1>, vector<1x128xf32>
    %c1_i32_15 = arith.constant 1 : i32
    %151 = vector.broadcast %c1_i32_15 : i32 to vector<1x128xi32>
    %152 = arith.cmpi eq, %14, %151 : vector<1x128xi32>
    %153 = vector.extract_strided_slice %145 {offsets = [1, 0], sizes = [1, 128], strides = [1, 1]} : vector<2x128xf32> to vector<1x128xf32>
    %154 = arith.select %152, %153, %150 : vector<1x128xi1>, vector<1x128xf32>
    %c0_16 = arith.constant 0 : index
    %c0_17 = arith.constant 0 : index
    %155 = vector.load %arg7[%c0_16, %c0_17] : memref<1x128xf32, #tpu.memory_space<vmem>>, vector<1x128xf32>
    tpu.vector_store %arg7[%c0_16, %c0_17], %154 {strides = array<i32>} : memref<1x128xf32, #tpu.memory_space<vmem>>, vector<1x128xf32>,
    %c3_i32_18 = arith.constant 3 : i32
    %156 = vector.broadcast %c3_i32_18 : i32 to vector<1x128xi32>
    %157 = arith.andi %0, %156 : vector<1x128xi32>
    %158 = tpu.iota {dimensions = array<i32: 0>} : vector<4x128xi32>
    %159 = vector.broadcast %157 : vector<1x128xi32> to vector<4x128xi32>
    %160 = arith.cmpi eq, %158, %159 : vector<4x128xi32>
    %161 = arith.extui %160 : vector<4x128xi1> to vector<4x128xi32>
    %162 = arith.sitofp %161 : vector<4x128xi32> to vector<4x128xf32>
    %163 = tpu.iota {dimensions = array<i32: 0>} : vector<40x4xi32>
    %c0_19 = arith.constant 0 : index
    %c0_20 = arith.constant 0 : index
    %164 = vector.load %arg4[%c0_19, %c0_20] : memref<4x4xi32, #tpu.memory_space<vmem>>, vector<1x4xi32>
    %165 = vector.broadcast %164 : vector<1x4xi32> to vector<40x4xi32>
    %166 = arith.cmpi eq, %163, %165 : vector<40x4xi32>
    %167 = arith.extui %166 : vector<40x4xi1> to vector<40x4xi32>
    %168 = arith.sitofp %167 : vector<40x4xi32> to vector<40x4xf32>
    %cst_21 = arith.constant dense<0.000000e+00> : vector<2x4xf32>
    %169 = tpu.matmul %2, %168, %cst_21 {dimension_numbers = #tpu.dot_dimension_numbers<[1], [0], [0], [1], [0, 0, 1, 1], [], []>} : vector<2x40xf32>, vector<40x4xf32>, vector<2x4xf32> -> vector<2x4xf32>
    %cst_22 = arith.constant dense<0.000000e+00> : vector<2x128xf32>
    %170 = tpu.matmul %169, %162, %cst_22 {dimension_numbers = #tpu.dot_dimension_numbers<[1], [0], [0], [1], [0, 0, 1, 1], [], []>} : vector<2x4xf32>, vector<4x128xf32>, vector<2x128xf32> -> vector<2x128xf32>
    %c0_23 = arith.constant 0 : index
    %c0_24 = arith.constant 0 : index
    %171 = vector.load %arg8[%c0_23, %c0_24] : memref<8x128xf32, #tpu.memory_space<vmem>>, vector<2x128xf32>
    tpu.vector_store %arg8[%c0_23, %c0_24], %170 {strides = array<i32>} : memref<8x128xf32, #tpu.memory_space<vmem>>, vector<2x128xf32>,
    %c1 = arith.constant 1 : index
    %c0_25 = arith.constant 0 : index
    %172 = vector.load %arg4[%c1, %c0_25] : memref<4x4xi32, #tpu.memory_space<vmem>>, vector<1x4xi32>
    %173 = vector.broadcast %172 : vector<1x4xi32> to vector<40x4xi32>
    %174 = arith.cmpi eq, %163, %173 : vector<40x4xi32>
    %175 = arith.extui %174 : vector<40x4xi1> to vector<40x4xi32>
    %176 = arith.sitofp %175 : vector<40x4xi32> to vector<40x4xf32>
    %cst_26 = arith.constant dense<0.000000e+00> : vector<2x4xf32>
    %177 = tpu.matmul %2, %176, %cst_26 {dimension_numbers = #tpu.dot_dimension_numbers<[1], [0], [0], [1], [0, 0, 1, 1], [], []>} : vector<2x40xf32>, vector<40x4xf32>, vector<2x4xf32> -> vector<2x4xf32>
    %cst_27 = arith.constant dense<0.000000e+00> : vector<2x128xf32>
    %178 = tpu.matmul %177, %162, %cst_27 {dimension_numbers = #tpu.dot_dimension_numbers<[1], [0], [0], [1], [0, 0, 1, 1], [], []>} : vector<2x4xf32>, vector<4x128xf32>, vector<2x128xf32> -> vector<2x128xf32>
    %c2 = arith.constant 2 : index
    %c0_28 = arith.constant 0 : index
    %179 = vector.load %arg8[%c2, %c0_28] : memref<8x128xf32, #tpu.memory_space<vmem>>, vector<2x128xf32>
    tpu.vector_store %arg8[%c2, %c0_28], %178 {strides = array<i32>} : memref<8x128xf32, #tpu.memory_space<vmem>>, vector<2x128xf32>,
    %c2_29 = arith.constant 2 : index
    %c0_30 = arith.constant 0 : index
    %180 = vector.load %arg4[%c2_29, %c0_30] : memref<4x4xi32, #tpu.memory_space<vmem>>, vector<1x4xi32>
    %181 = vector.broadcast %180 : vector<1x4xi32> to vector<40x4xi32>
    %182 = arith.cmpi eq, %163, %181 : vector<40x4xi32>
    %183 = arith.extui %182 : vector<40x4xi1> to vector<40x4xi32>
    %184 = arith.sitofp %183 : vector<40x4xi32> to vector<40x4xf32>
    %cst_31 = arith.constant dense<0.000000e+00> : vector<2x4xf32>
    %185 = tpu.matmul %2, %184, %cst_31 {dimension_numbers = #tpu.dot_dimension_numbers<[1], [0], [0], [1], [0, 0, 1, 1], [], []>} : vector<2x40xf32>, vector<40x4xf32>, vector<2x4xf32> -> vector<2x4xf32>
    %cst_32 = arith.constant dense<0.000000e+00> : vector<2x128xf32>
    %186 = tpu.matmul %185, %162, %cst_32 {dimension_numbers = #tpu.dot_dimension_numbers<[1], [0], [0], [1], [0, 0, 1, 1], [], []>} : vector<2x4xf32>, vector<4x128xf32>, vector<2x128xf32> -> vector<2x128xf32>
    %c4 = arith.constant 4 : index
    %c0_33 = arith.constant 0 : index
    %187 = vector.load %arg8[%c4, %c0_33] : memref<8x128xf32, #tpu.memory_space<vmem>>, vector<2x128xf32>
    tpu.vector_store %arg8[%c4, %c0_33], %186 {strides = array<i32>} : memref<8x128xf32, #tpu.memory_space<vmem>>, vector<2x128xf32>,
    %c3 = arith.constant 3 : index
    %c0_34 = arith.constant 0 : index
    %188 = vector.load %arg4[%c3, %c0_34] : memref<4x4xi32, #tpu.memory_space<vmem>>, vector<1x4xi32>
    %189 = vector.broadcast %188 : vector<1x4xi32> to vector<40x4xi32>
    %190 = arith.cmpi eq, %163, %189 : vector<40x4xi32>
    %191 = arith.extui %190 : vector<40x4xi1> to vector<40x4xi32>
    %192 = arith.sitofp %191 : vector<40x4xi32> to vector<40x4xf32>
    %cst_35 = arith.constant dense<0.000000e+00> : vector<2x4xf32>
    %193 = tpu.matmul %2, %192, %cst_35 {dimension_numbers = #tpu.dot_dimension_numbers<[1], [0], [0], [1], [0, 0, 1, 1], [], []>} : vector<2x40xf32>, vector<40x4xf32>, vector<2x4xf32> -> vector<2x4xf32>
    %cst_36 = arith.constant dense<0.000000e+00> : vector<2x128xf32>
    %194 = tpu.matmul %193, %162, %cst_36 {dimension_numbers = #tpu.dot_dimension_numbers<[1], [0], [0], [1], [0, 0, 1, 1], [], []>} : vector<2x4xf32>, vector<4x128xf32>, vector<2x128xf32> -> vector<2x128xf32>
    %c6 = arith.constant 6 : index
    %c0_37 = arith.constant 0 : index
    %195 = vector.load %arg8[%c6, %c0_37] : memref<8x128xf32, #tpu.memory_space<vmem>>, vector<2x128xf32>
    tpu.vector_store %arg8[%c6, %c0_37], %194 {strides = array<i32>} : memref<8x128xf32, #tpu.memory_space<vmem>>, vector<2x128xf32>,
    %196 = tpu.iota {dimensions = array<i32: 0>} : vector<4x128xi32>
    %197 = vector.broadcast %1 : vector<1x128xi32> to vector<4x128xi32>
    %198 = arith.cmpi eq, %196, %197 : vector<4x128xi32>
    %199 = arith.extui %198 : vector<4x128xi1> to vector<4x128xi32>
    %c0_i32_38 = arith.constant 0 : i32
    %200 = vector.broadcast %c0_i32_38 : i32 to vector<4x128xi32>
    %201 = vector.extract_strided_slice %199 {offsets = [0, 0], sizes = [1, 128], strides = [1, 1]} : vector<4x128xi32> to vector<1x128xi32>
    %c0_39 = arith.constant 0 : index
    %c0_40 = arith.constant 0 : index
    %202 = vector.load %arg4[%c0_39, %c0_40] : memref<4x4xi32, #tpu.memory_space<vmem>>, vector<4x1xi32>
    %203 = vector.broadcast %201 : vector<1x128xi32> to vector<4x128xi32>
    %204 = vector.broadcast %202 : vector<4x1xi32> to vector<4x128xi32>
    %205 = arith.muli %203, %204 : vector<4x128xi32>
    %206 = arith.addi %200, %205 : vector<4x128xi32>
    %207 = vector.extract_strided_slice %199 {offsets = [1, 0], sizes = [1, 128], strides = [1, 1]} : vector<4x128xi32> to vector<1x128xi32>
    %c0_41 = arith.constant 0 : index
    %c1_42 = arith.constant 1 : index
    %208 = vector.load %arg4[%c0_41, %c1_42] : memref<4x4xi32, #tpu.memory_space<vmem>>, vector<4x1xi32>
    %209 = vector.broadcast %207 : vector<1x128xi32> to vector<4x128xi32>
    %210 = vector.broadcast %208 : vector<4x1xi32> to vector<4x128xi32>
    %211 = arith.muli %209, %210 : vector<4x128xi32>
    %212 = arith.addi %206, %211 : vector<4x128xi32>
    %213 = vector.extract_strided_slice %199 {offsets = [2, 0], sizes = [1, 128], strides = [1, 1]} : vector<4x128xi32> to vector<1x128xi32>
    %c0_43 = arith.constant 0 : index
    %c2_44 = arith.constant 2 : index
    %214 = vector.load %arg4[%c0_43, %c2_44] : memref<4x4xi32, #tpu.memory_space<vmem>>, vector<4x1xi32>
    %215 = vector.broadcast %213 : vector<1x128xi32> to vector<4x128xi32>
    %216 = vector.broadcast %214 : vector<4x1xi32> to vector<4x128xi32>
    %217 = arith.muli %215, %216 : vector<4x128xi32>
    %218 = arith.addi %212, %217 : vector<4x128xi32>
    %219 = vector.extract_strided_slice %199 {offsets = [3, 0], sizes = [1, 128], strides = [1, 1]} : vector<4x128xi32> to vector<1x128xi32>
    %c0_45 = arith.constant 0 : index
    %c3_46 = arith.constant 3 : index
    %220 = vector.load %arg4[%c0_45, %c3_46] : memref<4x4xi32, #tpu.memory_space<vmem>>, vector<4x1xi32>
    %221 = vector.broadcast %219 : vector<1x128xi32> to vector<4x128xi32>
    %222 = vector.broadcast %220 : vector<4x1xi32> to vector<4x128xi32>
    %223 = arith.muli %221, %222 : vector<4x128xi32>
    %224 = arith.addi %218, %223 : vector<4x128xi32>
    %c0_47 = arith.constant 0 : index
    %c0_48 = arith.constant 0 : index
    %225 = vector.load %arg9[%c0_47, %c0_48] : memref<4x128xi32, #tpu.memory_space<vmem>>, vector<4x128xi32>
    tpu.vector_store %arg9[%c0_47, %c0_48], %224 {strides = array<i32>} : memref<4x128xi32, #tpu.memory_space<vmem>>, vector<4x128xi32>,
    return
  }
  func.func @transform_0(%arg0: i32) -> (i32, i32) {
    %c0_i32 = arith.constant 0 : i32
    %c0_i32_0 = arith.constant 0 : i32
    return %c0_i32, %arg0 : i32, i32
  }
  func.func @transform_1(%arg0: i32) -> (i32, i32) {
    %c0_i32 = arith.constant 0 : i32
    %c0_i32_0 = arith.constant 0 : i32
    return %c0_i32, %arg0 : i32, i32
  }
  func.func @transform_2(%arg0: i32) -> (i32, i32) {
    %c0_i32 = arith.constant 0 : i32
    %c0_i32_0 = arith.constant 0 : i32
    %c0_i32_1 = arith.constant 0 : i32
    return %c0_i32, %c0_i32_0 : i32, i32
  }
  func.func @transform_3(%arg0: i32) -> (i32, i32) {
    %c0_i32 = arith.constant 0 : i32
    %c0_i32_0 = arith.constant 0 : i32
    %c0_i32_1 = arith.constant 0 : i32
    return %c0_i32, %c0_i32_0 : i32, i32
  }
  func.func @transform_4(%arg0: i32) -> (i32, i32) {
    %c0_i32 = arith.constant 0 : i32
    %c0_i32_0 = arith.constant 0 : i32
    %c0_i32_1 = arith.constant 0 : i32
    return %c0_i32, %c0_i32_0 : i32, i32
  }
  func.func @transform_5(%arg0: i32) -> (i32, i32, i32) {
    %c0_i32 = arith.constant 0 : i32
    %c0_i32_0 = arith.constant 0 : i32
    %c0_i32_1 = arith.constant 0 : i32
    return %arg0, %c0_i32, %c0_i32_0 : i32, i32, i32
  }
  func.func @transform_6(%arg0: i32) -> (i32, i32) {
    %c0_i32 = arith.constant 0 : i32
    %c0_i32_0 = arith.constant 0 : i32
    return %c0_i32, %arg0 : i32, i32
  }
  func.func @transform_7(%arg0: i32) -> (i32, i32) {
    %c0_i32 = arith.constant 0 : i32
    %c0_i32_0 = arith.constant 0 : i32
    return %c0_i32, %arg0 : i32, i32
  }
  func.func @transform_8(%arg0: i32) -> (i32, i32) {
    %c0_i32 = arith.constant 0 : i32
    %c0_i32_0 = arith.constant 0 : i32
    return %c0_i32, %arg0 : i32, i32
  }
}

</mosaic_0001>

<bundles_post_ra>
// kernel: tpu_custom_call.1
= control target key start
LH: loop header
LB: loop body
LE: loop exit
PB: predicated region body
PF: predicated region fallthrough
CT: control target
= control target key end

     0   :  { %s2105_s0 = inlined_call_operand.hbm [shape: s32[1,256], index: 0, kind: input, shape index: {}]   ;;  %s2106_s1 = inlined_call_operand.hbm [shape: s32[1,256], index: 1, kind: input, shape index: {}]   ;;  %s2107_s2 = inlined_call_operand.vmem [shape: s32[1,16], index: 2, kind: input, shape index: {}]   ;;  %s2108_s3 = inlined_call_operand.hbm [shape: s32[4,4], index: 3, kind: input, shape index: {}]   ;;  %s2109_s4 = inlined_call_operand.vmem [shape: f32[2,40], index: 4, kind: input, shape index: {}]   ;;  %s2110_s5 = inlined_call_operand.hbm [shape: f32[2,2,16], index: 5, kind: output, shape index: {0}]   ;;  %s2111_s6 = inlined_call_operand.hbm [shape: f32[1,256], index: 6, kind: output, shape index: {1}]   ;;  %s2112_s7 = inlined_call_operand.hbm [shape: f32[8,256], index: 7, kind: output, shape index: {2}]   ;;  %s2113_s8 = inlined_call_operand.hbm [shape: s32[4,256], index: 8, kind: output, shape index: {3}]  }
   0x1   :  { %2122 = sst [smem:[#allocation26_spill]] %s2108_s3 }
   0x2   :  { %14 = vsyncpa [#allocation3], 0 }
   0x3   :  { %16 = vsyncpa [#allocation3 + $0x1], 0 }
   0x4   :  { %17 = vsyncpa [#allocation6], 0 }
   0x5   :  { %19 = vsyncpa [#allocation6 + $0x1], 0 }
   0x6   :  { %20 = vsyncpa [#allocation4], 0 }
   0x7   :  { %22 = vsyncpa [#allocation4 + $0x1], 0 }
   0x8   :  { %23 = vsyncpa [#allocation10], 0 }
   0x9   :  { %25 = vsyncpa [#allocation10 + $0x1], 0 }
   0xa   :  { %26 = vsyncpa [#allocation13], 0 }
   0xb   :  { %28 = vsyncpa [#allocation13 + $0x1], 0  ;;  %s1667_s27 = smov 0   ;;  %s1669_s28 = smov 0  }
   0xc   :  { %s1671_s29 = smov 0   ;;  %s1673_s30 = smov 0  }
   0xd LB: > { %2123 = sst [smem:[#allocation20_spill]] %s1589_s27  ;;  %s1688_s9 = sadd.s32 4294967295, %s1601_s30   ;;  %s1601_s30 = sphi %s1673_s30, %s2150_s30   ;;  %s1597_s29 = sphi %s1671_s29, %s2152_s29   ;;  %s1593_s28 = sphi %s1669_s28, %s2154_s28   ;;  %s1589_s27 = sphi %s1667_s27, %s2153_s27  }
   0xe   : > { %2124 = sst [smem:[#allocation21_spill]] %s1597_s29  ;;  %s2114_s10 = sadd.s32 4294967294, %s1601_s30  }
   0xf   : > { %2125 = sst [smem:[#allocation22_spill]] %s1601_s30  ;;  %p54_p0 = scmp.ne.s32.totalorder %s1593_s28, %s1589_s27 }
  0x10   : > { %p55_p1 = scmp.eq.s32.totalorder %s1688_s9, 0  ;;  %p167_p2 = scmp.eq.s32.totalorder %s1688_s9, 1 }
  0x11   : > { %p173_p3 = scmp.eq.s32.totalorder %s2114_s10, 1  ;;  %p1143_p5 = scmp.ge.s32.totalorder %s1601_s30, 1 }
  0x12   : > { %p1699_p4 = por %p55_p1, %p54_p0  ;;  %p258_p7 = scmp.lt.s32.totalorder %s1601_s30, 3 }
  0x13   : > { %p1704_p6 = por %p173_p3, %p54_p0  ;;  %s2129_s3 = sld [smem:[#allocation26_spill]] }
  0x14   : > { %p1712_p8 = pnand %p1143_p5, %p258_p7  ;;  %s1603_s17 = smov [#allocation7]  }
  0x15   : > { %s2127_s12 = scalar_select %p1704_p6, 1, 0 }
  0x16   : > { %p1239_p10 = pneg %p1712_p8  ;;  %s275_s18 = sshll.u32 %s1603_s17, 4  ;;  %s276_s18 = int_to_ptr.vmem [resolvable:$true] %s275_s18 }
  0x17   : > { %2128 = sst [smem:[#allocation23_spill]] %s2127_s12  ;;  %s1722_s19 = sadd.s32 1, %s1601_s30  }
  0x18   : > { %p1240_p11 = pnand %p1239_p10, %p55_p1  ;;  %2131 = sst [smem:[#allocation24_spill]] %s1722_s19 }
  0x19   : > { %s273_s15 = sshll.u32 %s2129_s3, 4  ;;  %s41_s20 = sadd.s32 1, %s1597_s29  ;;  %s274_s15 = int_to_ptr.hbm [resolvable:$true] %s273_s15 }
  0x1a   : > { %s38_s21 = ssub.s32 %s1601_s30, %s1722_s19  ;;  %p48_p13 = scmp.ne.s32.totalorder %s1597_s29, %s1593_s28 }
  0x1b   : > { %1242 = dma.hbm_to_vmem [thread:$0]  (!%p1240_p11), %s274_s15, 64, %s276_s18, [#allocation6]  }
  0x1c   : > { %p39_p12 = scmp.eq.s32.totalorder %s38_s21, 0  ;;  %p49_p0 = scmp.eq.s32.totalorder %s1601_s30, 0 }
  0x1d   : > { %p1264_p3 = scmp.lt.s32.totalorder %s1601_s30, 2  ;;  %p1736_p7 = por %p167_p2, %p48_p13 }
  0x1e   : > { %s1732_s22 = scalar_select %p39_p12, %s1597_s29, %s41_s20  }
  0x1f   : > { %p50_p5 = por %p49_p0, %p48_p13  ;;  %s289_s24 = sand.u32 1, %s1597_s29  }
  0x20   : > { %2132 = sst [smem:[#allocation25_spill]] %s1732_s22  ;;  %s295_s13 = scalar_lea.hbm %s2105_s0, %s1601_s30 }
  0x21   : > { %s297_s14 = sshll.u32 %s295_s13, 4  ;;  %s292_s15 = scalar_lea.vmem [#allocation2], %s289_s24  ;;  %s298_s14 = int_to_ptr.hbm [resolvable:$true] %s297_s14 }
  0x22   : > { %s299_s17 = sshll.u32 %s292_s15, 4  ;;  %p1745_p10 = pnand %p1264_p3, %p50_p5  ;;  %s300_s17 = int_to_ptr.vmem [resolvable:$true] %s299_s17 }
  0x23   : > { %s306_s20 = sand.u32 1, %s1601_s30   ;;  %s312_s3 = scalar_lea.hbm %s2106_s1, %s1601_s30 }
  0x24   : > { %s290_s22 = scalar_lea.sflag [#allocation3], %s289_s24  ;;  %s1375_s29 = sshra.s32 %s298_s14, 4  ;;  %s1376_s29 = int_to_ptr.hbm [resolvable:$true] %s1375_s29 }
  0x25   : > { %s1377_s25 = scalar_lea.hbm %s1376_s29, 1  ;;  %p1379_p11 = pneg %p1745_p10 }
  0x26   : > { %p1378_p2 = scmp.ne.s32.totalorder %s1376_s29, %s1377_s25  ;;  %s1382_s15 = scalar_lea.hbm %s2105_s0, 2 }
  0x27   : > { %p1383_p0 = scmp.lt.s32.totalorder %s1376_s29, %s2105_s0  ;;  %p1384_p3 = scmp.lt.s32.totalorder %s1382_s15, %s1377_s25 }
  0x28   : > { %p1380_p12 = pnand %p1379_p11, %p1378_p2 }
  0x29   : > { %p1385_p5 = por %p1384_p3, %p1383_p0 }
  0x2a   : > { %p1381_p13 = pneg %p1380_p12 }
  0x2c   : > { %p1386_p9 = pnand %p1385_p5, %p1381_p13 }
  0x2e   : > { %1389 = shalt.err (!%p1386_p9)
}
  0x2f   : > { %1246 = dma.hbm_to_vmem [thread:$0]  (!%p1745_p10), %s298_s14, 16, %s300_s17, %s290_s22  }
  0x30   : > { %s314_s10 = sshll.u32 %s312_s3, 4  ;;  %s309_s21 = scalar_lea.vmem [#allocation5], %s289_s24  ;;  %s315_s10 = int_to_ptr.hbm [resolvable:$true] %s314_s10 }
  0x31   : > { %s316_s30 = sshll.u32 %s309_s21, 4  ;;  %s307_s27 = scalar_lea.sflag [#allocation6], %s306_s20  ;;  %s317_s30 = int_to_ptr.vmem [resolvable:$true] %s316_s30 }
  0x32   : > { %s1405_s26 = sshra.s32 %s315_s10, 4  ;;  %s1412_s19 = scalar_lea.hbm %s2106_s1, 2  ;;  %s1406_s26 = int_to_ptr.hbm [resolvable:$true] %s1405_s26 }
  0x33   : > { %s1407_s13 = scalar_lea.hbm %s1406_s26, 1  ;;  %p1413_p9 = scmp.lt.s32.totalorder %s1406_s26, %s2106_s1 }
  0x34   : > { %p1408_p2 = scmp.ne.s32.totalorder %s1406_s26, %s1407_s13  ;;  %p1414_p13 = scmp.lt.s32.totalorder %s1412_s19, %s1407_s13 }
  0x36   : > { %p1410_p12 = pnand %p1408_p2, %p1379_p11  ;;  %p1415_p3 = por %p1414_p13, %p1413_p9 }
  0x38   : > { %p1411_p0 = pneg %p1410_p12 }
  0x3a   : > { %p1416_p5 = pnand %p1415_p3, %p1411_p0 }
  0x3c   : > { %1419 = shalt.err (!%p1416_p5)
}
  0x3d   : > { %1249 = dma.hbm_to_vmem [thread:$0]  (!%p1745_p10), %s315_s10, 16, %s317_s30, %s307_s27  }
  0x3e   : > { %325 = sbr.rel (%p1712_p8) target bundleno = 498 (0x1f2), region = 40  ;;  %s1781_s3 = sand.u32 (!%p1712_p8), 1, %s1593_s28  }
  0x3f   : > { %s328_s24 = scalar_lea.sflag (!%p1712_p8), [#allocation3], %s1781_s3  ;;  %s330_s14 = scalar_lea.vmem (!%p1712_p8), [#allocation2], %s1781_s3 }
  0x43   : > { %1564 = dma.done.wait (%p1699_p4), %s328_s24, 16  }
  0x44   : > { %1566 = vsyncadd (%p1699_p4), %s328_s24, 4294967280  ;;  %s336_s27 = sand.u32 1, %s1688_s9   ;;  %s339_s16 = scalar_lea.vmem [#allocation5], %s1781_s3 }
  0x45   : > { %s337_s30 = scalar_lea.sflag [#allocation6], %s336_s27 }
  0x46   : > { %1568 = dma.done.wait (%p1699_p4), %s337_s30, 16  }
  0x47   : > { %1570 = vsyncadd (%p1699_p4), %s337_s30, 4294967280 }
  0x48   : > { %1572 = dma.done.wait (%p55_p1), [#allocation6], 64  }
  0x49   : > { %1574 = vsyncadd (%p55_p1), [#allocation6], 4294967232  ;;  %v399_v0 = vlaneseq  ;;  %v1339_v5 = vld [vmem:[#allocation7] ss:$0 sm:$0xff]  ;;  %v1340_v6 = vld [vmem:[#allocation7 + $0x1] ss:$0 sm:$0xff] }
  0x4a   : > { %v1341_v8 = vld [vmem:[%s2107_s2] ss:$0 sm:$0xff]  ;;  %v1604_v9 = vmov 1.0   ;;  %vm421_vm13 = vcmask 326656   ;;  %v1605_v14 = vmov 0.0   ;;  %v1606_v18 = vmov 0  }
  0x4b   : > { %v1801_v1 = vshrl.u32 %v399_v0, 7  ;;  %v1843_v10 = vld [vmem:[%s2109_s4] sm:$0x3]  ;;  %v1343_v16 = vld [vmem:[#allocation7 + $0x2] ss:$0 sm:$0xff]  ;;  %1318 = vset.pattern.permute.xlu1 %v1606_v18  ;;  %1319 = vset.pattern.permute.xlu0 %v1606_v18  ;;  %v1607_v19 = vmov 4  }
  0x4c   : > { %v1861_v11 = vld [vmem:[%s330_s14] sm:$0x1]  ;;  %v1865_v17 = vld [vmem:[#allocation7] sm:$0xf]  ;;  %1323 = vset.pattern.permute.xlu2 %v1607_v19  ;;  %v1608_v21 = vmov 2   ;;  %v1609_v25 = vmov 3  }
  0x4d   : > { %v1804_v2 = vadd.s32 32, %v1801_v1  ;;  %v1807_v3 = vadd.s32 24, %v1801_v1  ;;  %v1810_v4 = vadd.s32 16, %v1801_v1  ;;  %v1813_v7 = vadd.s32 8, %v1801_v1  ;;  %864 = vperm.xlu1 %1318, %v1865_v17   ;;  %v1342_v20 = vld [vmem:[#allocation7 + $0x3] ss:$0 sm:$0xff] }
  0x4e   : > { %vm611_vm11 = vcmp.eq.s32.totalorder %v1801_v1, %v1339_v5  ;;  %vm677_vm14 = vcmp.eq.s32.totalorder %v1801_v1, %v1340_v6  ;;  %vm406_vm15 = vcmp.eq.s32.totalorder %v1801_v1, %v1341_v8  ;;  %v604_v12 = vand.u32 3, %v1861_v11  ;;  %s1148_s15 = sshll.u32 %s1781_s3, 1  ;;  %s1149_s21 = sshll.u32 %s1781_s3, 3 }
  0x4f   : > { %vm615_vm0 = vcmp.eq.s32.totalorder %v1804_v2, %v1339_v5  ;;  %vm614_vm1 = vcmp.eq.s32.totalorder %v1807_v3, %v1339_v5  ;;  %vm681_vm2 = vcmp.eq.s32.totalorder %v1804_v2, %v1340_v6  ;;  %vm680_vm3 = vcmp.eq.s32.totalorder %v1807_v3, %v1340_v6  ;;  %s1918_s10 = scalar_lea.vmem [#allocation8], %s1148_s15  ;;  %s1952_s26 = scalar_lea.vmem [#allocation11], %s1149_s21 }
  0x50   : > { %1168 = vmatpush.msk.msra.mxu1 %vm615_vm0, %v1604_v9  ;;  %1181 = vmatpush.msk.msra.mxu3 %vm681_vm2, %v1604_v9  ;;  %vm613_vm4 = vcmp.eq.s32.totalorder %v1810_v4, %v1339_v5  ;;  %vm410_vm5 = vcmp.eq.s32.totalorder %v1804_v2, %v1341_v8  ;;  %vm409_vm6 = vcmp.eq.s32.totalorder %v1807_v3, %v1341_v8  ;;  %v605_v13 = vperm.slane %v604_v12, 0  ;;  %s1218_s13 = sshll.u32 %s1688_s9, 1  ;;  %s913_s25 = sshll.u32 %s1918_s10, 4  ;;  %s914_s25 = int_to_ptr.vmem [resolvable:$true] %s913_s25 }
  0x51   : > { %vm679_vm7 = vcmp.eq.s32.totalorder %v1810_v4, %v1340_v6  ;;  %1156 = vmatpush.msk.msra.mxu0 %vm410_vm5, %v1604_v9  ;;  %vm612_vm8 = vcmp.eq.s32.totalorder %v1813_v7, %v1339_v5  ;;  %vm408_vm9 = vcmp.eq.s32.totalorder %v1810_v4, %v1341_v8  ;;  %vm678_vm10 = vcmp.eq.s32.totalorder %v1813_v7, %v1340_v6  ;;  %s911_s19 = scalar_lea.hbm %s2110_s5, %s1218_s13  ;;  %s887_s24 = scalar_lea.sflag [#allocation4], %s1781_s3 }
  0x52   : > { %1169 = vmatpush.msk.msra.mxu1 %vm614_vm1, %v1604_v9  ;;  %1182 = vmatpush.msk.msra.mxu3 %vm680_vm3, %v1604_v9  ;;  %vm407_vm12 = vcmp.eq.s32.totalorder %v1813_v7, %v1341_v8  ;;  %vm606_vm0 = vcmp.eq.s32.totalorder %v1801_v1, %v605_v13  ;;  %vm650_vm1 = vcmask 1043456   ;;  %vm742_vm2 = vcmp.eq.s32.totalorder %v1804_v2, %v1343_v16  ;;  %s915_s22 = sshll.u32 %s911_s19, 4  ;;  %s1455_s17 = scalar_lea.hbm %s2110_s5, 4  ;;  %s916_s22 = int_to_ptr.hbm [resolvable:$true] %s915_s22 }
  0x53   : > { %1157 = vmatpush.msk.msra.mxu0 %vm409_vm6, %v1604_v9  ;;  %v1162_v15 = vsel %vm606_vm0, 1.0, %v1605_v14  ;;  %vm741_vm3 = vcmp.eq.s32.totalorder %v1807_v3, %v1343_v16  ;;  %vm739_vm5 = vcmp.eq.s32.totalorder %v1813_v7, %v1343_v16  ;;  %vm738_vm6 = vcmp.eq.s32.totalorder %v1801_v1, %v1343_v16  ;;  %s1449_s14 = sshra.s32 %s916_s22, 4  ;;  %s1450_s14 = int_to_ptr.hbm [resolvable:$true] %s1449_s14 }
  0x54   : > { %1170 = vmatpush.msk.msra.mxu1 %vm613_vm4, %v1604_v9  ;;  %1183 = vmatpush.msk.msra.mxu3 %vm679_vm7, %v1604_v9  ;;  %vm740_vm4 = vcmp.eq.s32.totalorder %v1810_v4, %v1343_v16  ;;  %vm646_vm7 = vcmask 31744   ;;  %v1610_v26 = vmov 1   ;;  %v1611_v27 = vmov 5   ;;  %s1451_s30 = scalar_lea.hbm %s1450_s14, 2  ;;  %p1456_p10 = scmp.lt.s32.totalorder %s1450_s14, %s2110_s5 }
  0x55   : > { %1158 = vmatpush.msk.msra.mxu0 %vm408_vm9, %v1604_v9  ;;  %1174 = vmatpush.msk.msra.mxu2 %vm650_vm1, %v1162_v15  ;;  %vm802_vm9 = vcmp.eq.s32.totalorder %v1807_v3, %v1342_v20  ;;  %v1612_v28 = vmov 6   ;;  %v1613_v29 = vmov 8   ;;  %v1614_v30 = vmov 7   ;;  %p1452_p1 = scmp.ne.s32.totalorder %s1450_s14, %s1451_s30  ;;  %p1457_p11 = scmp.lt.s32.totalorder %s1455_s17, %s1451_s30 }
  0x56   : > { %1171 = vmatpush.msk.msra.mxu1 %vm612_vm8, %v1604_v9  ;;  %1184 = vmatpush.msk.msra.mxu3 %vm678_vm10, %v1604_v9  ;;  %vm803_vm8 = vcmp.eq.s32.totalorder %v1804_v2, %v1342_v20  ;;  %vm801_vm10 = vcmp.eq.s32.totalorder %v1810_v4, %v1342_v20  ;;  %v1615_v31 = vmov 9   ;;  %v1616_v32 = vmov 13  }
  0x57   : > { %1159 = vmatpush.msk.msra.mxu0 %vm407_vm12, %v1604_v9  ;;  %1187 = vmatpush.msk.msrb.mxu2 %vm650_vm1, %v1162_v15  ;;  %vm799_vm12 = vcmp.eq.s32.totalorder %v1801_v1, %v1342_v20  ;;  %v1617_v33 = vmov 10   ;;  %v1618_v34 = vmov 11   ;;  %v1619_v35 = vmov 12   ;;  %p1453_p4 = pnand %p1452_p1, %p1736_p7  ;;  %p1458_p2 = por %p1457_p11, %p1456_p10 }
  0x58   : > { %1172 = vmatpush.msk.msra.mxu1 %vm611_vm11, %v1604_v9  ;;  %1185 = vmatpush.msk.msra.mxu3 %vm677_vm14, %v1604_v9  ;;  %vm800_vm11 = vcmp.eq.s32.totalorder %v1813_v7, %v1342_v20  ;;  %v1620_v36 = vmov 14   ;;  %v1621_v37 = vmov 15   ;;  %v1925_v39 = vand.u32 15, %v1861_v11 }
  0x59   : > { %1173 = vmatmul.msk.f32.vlgmr.msra.gmra.mxu1 %vm421_vm13, %v1843_v10  ;;  %1186 = vmatmul.msk.f32.vlgmr.msra.gmra.mxu3 %vm421_vm13, %v1843_v10  ;;  %p1454_p8 = pneg %p1453_p4 }
  0x5a   : > { %1160 = vmatpush.msk.msra.mxu0 %vm406_vm15, %v1604_v9  ;;  %1213 = vmatpush.msk.msrb.mxu3 %vm650_vm1, %v1162_v15  ;;  %vm449_vm14 = vcmp.eq.s32.totalorder %v1925_v39, 0  ;;  %vm459_vm15 = vcmp.eq.s32.totalorder %v1925_v39, 1  ;;  %vm468_vm0 = vcmp.eq.s32.totalorder %v1925_v39, 2 }
  0x5b   : > { %1161 = vmatmul.msk.f32.vlgmr.msra.gmra.mxu0 %vm421_vm13, %v1843_v10  ;;  %1200 = vmatpush.msk.msrb.mxu1 %vm650_vm1, %v1162_v15  ;;  %vm477_vm1 = vcmp.eq.s32.totalorder %v1925_v39, 3  ;;  %v450_v43 = vsel %vm449_vm14, 1, %v1606_v18  ;;  %v460_v44 = vsel %vm459_vm15, 1, %v1606_v18  ;;  %v469_v45 = vsel %vm468_vm0, 1, %v1606_v18  ;;  %p1459_p12 = pnand %p1458_p2, %p1454_p8 }
  0x5c   : > { %1194 = vmatpush.msk.msrb.mxu0 %vm742_vm2, %v1604_v9  ;;  %1321 = vset.pattern.permute.xlu1 %v1608_v21  ;;  %v451_v46 = vperm.slane %v450_v43, 0  ;;  %v461_v47 = vperm.slane %v460_v44, 0  ;;  %v478_v48 = vsel %vm477_vm1, 1, %v1606_v18  ;;  %vm486_vm2 = vcmp.eq.s32.totalorder %v1925_v39, 4 }
  0x5d   : > { %v470_v50 = vperm.slane %v469_v45, 0  ;;  %v479_v52 = vperm.slane %v478_v48, 0  ;;  %v487_v53 = vsel %vm486_vm2, 1, %v1606_v18  ;;  %vm531_vm14 = vcmp.eq.s32.totalorder %v1925_v39, 9 }
  0x5e   : > { %1195 = vmatpush.msk.msrb.mxu0 %vm741_vm3, %v1604_v9  ;;  %vm1936_vm3 = vcmp.eq.s32.totalorder %v451_v46, 1  ;;  %v488_v58 = vperm.slane %v487_v53, 0  ;;  %v532_v13 = vsel %vm531_vm14, 1, %v1606_v18  ;;  %vm540_vm0 = vcmp.eq.s32.totalorder %v1925_v39, 10 }
  0x5f   : > { %v541_v19 = vsel %vm540_vm0, 1, %v1606_v18  ;;  %vm549_vm2 = vcmp.eq.s32.totalorder %v1925_v39, 11 }
  0x60   : > { %1196 = vmatpush.msk.msrb.mxu0 %vm740_vm4, %v1604_v9  ;;  %vm495_vm4 = vcmp.eq.s32.totalorder %v1925_v39, 5 }
  0x61   : > { %v496_v59 = vsel %vm495_vm4, 1, %v1606_v18  ;;  %vm558_vm4 = vcmp.eq.s32.totalorder %v1925_v39, 12 }
  0x62   : > { %1197 = vmatpush.msk.msrb.mxu0 %vm739_vm5, %v1604_v9  ;;  %vm462_vm5 = vcmp.eq.s32.totalorder %v461_v47, 1  ;;  %v497_v62 = vperm.slane %v496_v59, 0 }
  0x64   : > { %1198 = vmatpush.msk.msrb.mxu0 %vm738_vm6, %v1604_v9  ;;  %vm471_vm6 = vcmp.eq.s32.totalorder %v470_v50, 1 }
  0x65   : > { %1199 = vmatmul.msk.f32.vlgmr.msrb.gmra.mxu0 %vm421_vm13, %v1843_v10 }
  0xbf   : > { %v1922_v38 = vpop.permute.xlu1 %864 }
  0xd6   : > { %v643_v22 = vpop.f32.mrf.mxu1 }
  0xd7   : > { %1175 = vmatmul.msk.f32.vlgmr.msra.gmra.mxu2 %vm646_vm7, %v643_v22 }
  0xd8   : > { %1207 = vmatpush.msk.msra.mxu2 %vm803_vm8, %v1604_v9  ;;  %v1886_v23 = vpop.f32.mrf.mxu0  ;;  %vm504_vm8 = vcmp.eq.s32.totalorder %v1925_v39, 6 }
  0xd9   : > { %473 = vperm.xlu1 %1321, %v1886_v23   ;;  %455 = vperm.xlu0 %1319, %v1886_v23   ;;  %v505_v63 = vsel %vm504_vm8, 1, %v1606_v18 }
  0xda   : > { %1208 = vmatpush.msk.msra.mxu2 %vm802_vm9, %v1604_v9  ;;  %491 = vperm.xlu2 %1323, %v1886_v23   ;;  %vm480_vm9 = vcmp.eq.s32.totalorder %v479_v52, 1  ;;  %v506_v3 = vperm.slane %v505_v63, 0 }
  0xdc   : > { %1209 = vmatpush.msk.msra.mxu2 %vm801_vm10, %v1604_v9  ;;  %v709_v24 = vpop.f32.mrf.mxu3  ;;  %vm513_vm10 = vcmp.eq.s32.totalorder %v1925_v39, 7  ;;  %vm507_vm15 = vcmp.eq.s32.totalorder %v506_v3, 1 }
  0xdd   : > { %v514_v4 = vsel %vm513_vm10, 1, %v1606_v18 }
  0xde   : > { %1210 = vmatpush.msk.msra.mxu2 %vm800_vm11, %v1604_v9  ;;  %vm489_vm11 = vcmp.eq.s32.totalorder %v488_v58, 1  ;;  %v515_v8 = vperm.slane %v514_v4, 0 }
  0xdf   : > { %1188 = vmatmul.msk.f32.vlgmr.msrb.gmra.mxu2 %vm646_vm7, %v709_v24  ;;  %v550_v24 = vsel %vm549_vm2, 1, %v1606_v18 }
  0xe0   : > { %1211 = vmatpush.msk.msra.mxu2 %vm799_vm12, %v1604_v9  ;;  %vm522_vm12 = vcmp.eq.s32.totalorder %v1925_v39, 8  ;;  %vm516_vm1 = vcmp.eq.s32.totalorder %v515_v8, 1 }
  0xe1   : > { %1322 = vset.pattern.permute.xlu1 %v1609_v25  ;;  %1320 = vset.pattern.permute.xlu0 %v1610_v26  ;;  %v523_v9 = vsel %vm522_vm12, 1, %v1606_v18 }
  0xe2   : > { %482 = vperm.xlu1 %1322, %v1886_v23   ;;  %464 = vperm.xlu0 %1320, %v1886_v23   ;;  %v770_v51 = vpop.f32.mrf.mxu0  ;;  %v524_v12 = vperm.slane %v523_v9, 0 }
  0xe3   : > { %1324 = vset.pattern.permute.xlu2 %v1611_v27  ;;  %1201 = vmatmul.msk.f32.vlgmr.msrb.gmra.mxu1 %vm646_vm7, %v770_v51  ;;  %v559_v27 = vsel %vm558_vm4, 1, %v1606_v18 }
  0xe4   : > { %500 = vperm.xlu2 %1324, %v1886_v23  }
  0xe7   : > { %1212 = vmatmul.msk.f32.vlgmr.msra.gmra.mxu2 %vm421_vm13, %v1843_v10  ;;  %vm445_vm13 = vcmask 123904  }
  0xe8   : > { %446 = vst.msk [vmem:[%s1918_s10] sm:$0x3] %vm445_vm13, %v1886_v23  ;;  %vm498_vm13 = vcmp.eq.s32.totalorder %v497_v62, 1 }
  0xea   : > { %1325 = vset.pattern.permute.xlu1 %v1612_v28  ;;  %1327 = vset.pattern.permute.xlu0 %v1613_v29 }
  0xeb   : > { %509 = vperm.xlu1 %1325, %v1886_v23   ;;  %527 = vperm.xlu0 %1327, %v1886_v23  }
  0xec   : > { %1326 = vset.pattern.permute.xlu2 %v1614_v30 }
  0xed   : > { %518 = vperm.xlu2 %1326, %v1886_v23  }
  0xf3   : > { %1328 = vset.pattern.permute.xlu1 %v1615_v31  ;;  %1332 = vset.pattern.permute.xlu0 %v1616_v32  ;;  %v1344_v32 = vld [vmem:[%s339_s16] ss:$0 sm:$0xff] }
  0xf4   : > { %536 = vperm.xlu1 %1328, %v1886_v23   ;;  %572 = vperm.xlu0 %1332, %v1886_v23  }
  0xf5   : > { %1329 = vset.pattern.permute.xlu2 %v1617_v33  ;;  %v560_v33 = vperm.slane %v559_v27, 0 }
  0xf6   : > { %545 = vperm.xlu2 %1329, %v1886_v23  }
  0xf7   : > { %vm1981_vm12 = vcmp.eq.s32.totalorder %v560_v33, 1 }
  0xfc   : > { %1330 = vset.pattern.permute.xlu1 %v1618_v34  ;;  %1336 = vset.pattern.permute.xlu0 %v1608_v21 }
  0xfd   : > { %554 = vperm.xlu1 %1330, %v1886_v23   ;;  %875 = vperm.xlu0 %1336, %v1865_v17  }
  0xfe   : > { %1331 = vset.pattern.permute.xlu2 %v1619_v35 }
  0xff   : > { %563 = vperm.xlu2 %1331, %v1886_v23  }
 0x105   : > { %1333 = vset.pattern.permute.xlu1 %v1620_v36  ;;  %1338 = vset.pattern.permute.xlu0 %v1609_v25 }
 0x106   : > { %581 = vperm.xlu1 %1333, %v1886_v23  }
 0x107   : > { %1334 = vset.pattern.permute.xlu2 %v1621_v37 }
 0x108   : > { %590 = vperm.xlu2 %1334, %v1886_v23   ;;  %v542_v23 = vperm.slane %v541_v19, 0 }
 0x10a   : > { %vm1966_vm8 = vcmp.eq.s32.totalorder %v542_v23, 1 }
 0x10e   : > { %1337 = vset.pattern.permute.xlu1 %v1609_v25 }
 0x10f   : > { %881 = vperm.xlu1 %1337, %v1865_v17  }
 0x110   : > { %1335 = vset.pattern.permute.xlu2 %v1610_v26  ;;  %v551_v26 = vperm.slane %v550_v24, 0 }
 0x111   : > { %869 = vperm.xlu2 %1335, %v1865_v17   ;;  %v533_v17 = vperm.slane %v532_v13, 0 }
 0x112   : > { %vm552_vm10 = vcmp.eq.s32.totalorder %v551_v26, 1 }
 0x134   : > { %v492_v41 = vpop.permute.xlu2 %491 }
 0x13e   : > { %v501_v55 = vpop.permute.xlu2 %500 }
 0x147   : > { %v519_v5 = vpop.permute.xlu2 %518 }
 0x14b   : > { %v474_v40 = vpop.permute.xlu1 %473  ;;  %v456_v42 = vpop.permute.xlu0 %455 }
 0x14c   : > { %v458_v54 = vsel %vm1936_vm3, %v456_v42, 0.0  ;;  %vm525_vm3 = vcmp.eq.s32.totalorder %v524_v12, 1 }
 0x150   : > { %v546_v16 = vpop.permute.xlu2 %545 }
 0x154   : > { %v483_v56 = vpop.permute.xlu1 %482  ;;  %v465_v57 = vpop.permute.xlu0 %464 }
 0x155   : > { %v467_v60 = vsel %vm462_vm5, %v465_v57, %v458_v54  ;;  %vm534_vm5 = vcmp.eq.s32.totalorder %v533_v17, 1 }
 0x156   : > { %v476_v61 = vsel %vm471_vm6, %v474_v40, %v467_v60  ;;  %vm567_vm6 = vcmp.eq.s32.totalorder %v1925_v39, 13 }
 0x157   : > { %v485_v0 = vsel %vm480_vm9, %v483_v56, %v476_v61  ;;  %v568_v34 = vsel %vm567_vm6, 1, %v1606_v18  ;;  %vm576_vm9 = vcmp.eq.s32.totalorder %v1925_v39, 14 }
 0x158   : > { %v494_v6 = vsel %vm489_vm11, %v492_v41, %v485_v0  ;;  %vm585_vm11 = vcmp.eq.s32.totalorder %v1925_v39, 15  ;;  %v569_v37 = vperm.slane %v568_v34, 0  ;;  %v577_v40 = vsel %vm576_vm9, 1, %v1606_v18 }
 0x159   : > { %v503_v10 = vsel %vm498_vm13, %v501_v55, %v494_v6  ;;  %v564_v31 = vpop.permute.xlu2 %563  ;;  %v586_v43 = vsel %vm585_vm11, 1, %v1606_v18  ;;  %v578_v44 = vperm.slane %v577_v40, 0 }
 0x15a   : > { %v671_v2 = vpop.f32.mrf.mxu2  ;;  %vm1993_vm13 = vcmp.eq.s32.totalorder %v569_v37, 1  ;;  %v587_v48 = vperm.slane %v586_v43, 0 }
 0x15b   : > { %674 = vst [vmem:[%s1952_s26] sm:$0x3] %v671_v2 }
 0x15d   : > { %v510_v7 = vpop.permute.xlu1 %509  ;;  %v528_v22 = vpop.permute.xlu0 %527 }
 0x15e   : > { %v512_v14 = vsel %vm507_vm15, %v510_v7, %v503_v10 }
 0x15f   : > { %v521_v20 = vsel %vm516_vm1, %v519_v5, %v512_v14 }
 0x160   : > { %v530_v25 = vsel %vm525_vm3, %v528_v22, %v521_v20 }
 0x162   : > { %v732_v15 = vpop.f32.mrf.mxu2  ;;  %v591_v47 = vpop.permute.xlu2 %590 }
 0x163   : > { %735 = vst [vmem:[%s1952_s26 + $0x2] sm:$0x3] %v732_v15 }
 0x166   : > { %v537_v21 = vpop.permute.xlu1 %536  ;;  %v573_v39 = vpop.permute.xlu0 %572 }
 0x167   : > { %v539_v29 = vsel %vm534_vm5, %v537_v21, %v530_v25 }
 0x168   : > { %v548_v35 = vsel %vm1966_vm8, %v546_v16, %v539_v29 }
 0x16a   : > { %v831_v28 = vpop.f32.mrf.mxu2 }
 0x16b   : > { %1214 = vmatmul.msk.f32.vlgmr.msrb.gmra.mxu3 %vm646_vm7, %v831_v28  ;;  %vm859_vm7 = vcmp.eq.s32.totalorder %v1801_v1, %v1344_v32 }
 0x16c   : > { %v860_v1 = vsel %vm859_vm7, 1, %v1606_v18 }
 0x16f   : > { %v555_v36 = vpop.permute.xlu1 %554 }
 0x170   : > { %v557_v41 = vsel %vm552_vm10, %v555_v36, %v548_v35 }
 0x171   : > { %v566_v45 = vsel %vm1981_vm12, %v564_v31, %v557_v41 }
 0x172   : > { %1462 = shalt.err (!%p1459_p12)
}
 0x173   : > { %1231 = dma.vmem_to_hbm [thread:$0]  (%p1736_p7), %s914_s25, 32, %s916_s22, %s887_s24   ;;  %v862_v18 = vperm.slane %v860_v1, 0  ;;  %v575_v49 = vsel %vm1993_vm13, %v573_v39, %v566_v45  ;;  %vm579_vm14 = vcmp.eq.s32.totalorder %v578_v44, 1  ;;  %vm588_vm15 = vcmp.eq.s32.totalorder %v587_v48, 1  ;;  %v876_v55 = vpop.permute.xlu0 %875  ;;  %v870_v58 = vpop.permute.xlu2 %869 }
 0x174   : > { %v867_v51 = vperm.slane %v860_v1, 1  ;;  %v873_v52 = vperm.slane %v860_v1, 2  ;;  %v447_v54 = vshra.s32 %v1861_v11, 4  ;;  %s1220_s15 = sshll.u32 %s1688_s9, 2  ;;  %s924_s13 = scalar_lea.hbm %s2111_s6, %s1688_s9  ;;  %v879_v11 = vperm.slane %v860_v1, 3 }
 0x175   : > { %v866_v56 = vmul.u32 %v1922_v38, %v862_v18  ;;  %s1150_s29 = sshll.u32 %s1781_s3, 2  ;;  %s952_s25 = scalar_lea.hbm %s2113_s8, %s1220_s15 }
 0x176   : > { %v871_v59 = vmul.u32 %v870_v58, %v867_v51  ;;  %v877_v60 = vmul.u32 %v876_v55, %v873_v52  ;;  %vm2017_vm0 = vcmp.eq.s32.totalorder %v447_v54, 0  ;;  %s380_s22 = scalar_lea.vmem [#allocation9], %s1781_s3  ;;  %s2028_s14 = sshll.u32 %s924_s13, 4  ;;  %vm596_vm1 = vcmp.eq.s32.totalorder %v447_v54, 1  ;;  %s929_s14 = int_to_ptr.hbm [resolvable:$true] %s2028_s14 }
 0x177   : > { %s2026_s24 = sshll.u32 %s380_s22, 4  ;;  %s394_s30 = scalar_lea.vmem [#allocation12], %s1150_s29  ;;  %s927_s24 = int_to_ptr.vmem [resolvable:$true] %s2026_s24 }
 0x178   : > { %v582_v50 = vpop.permute.xlu1 %581  ;;  %v872_v62 = vadd.s32 %v871_v59, %v866_v56  ;;  %s954_s16 = sshll.u32 %s394_s30, 4  ;;  %s956_s11 = sshll.u32 %s952_s25, 4  ;;  %s2034_s16 = int_to_ptr.vmem [resolvable:$true] %s954_s16  ;;  %s2036_s11 = int_to_ptr.hbm [resolvable:$true] %s956_s11 }
 0x179   : > { %v584_v53 = vsel %vm579_vm14, %v582_v50, %v575_v49  ;;  %s2040_s17 = scalar_lea.sflag [#allocation10], %s336_s27  ;;  %s1477_s18 = sshra.s32 %s929_s14, 4  ;;  %s1478_s18 = int_to_ptr.hbm [resolvable:$true] %s1477_s18 }
 0x17a   : > { %v593_v57 = vsel %vm588_vm15, %v591_v47, %v584_v53  ;;  %v878_v63 = vadd.s32 %v877_v60, %v872_v62  ;;  %s1479_s20 = scalar_lea.hbm %s1478_s18, 1  ;;  %s1483_s21 = scalar_lea.hbm %s2111_s6, 2 }
 0x17b   : > { %598 = vst [vmem:[#allocation1] sm:$0xff] %v593_v57  ;;  %v595_v38 = vsel %vm2017_vm0, %v593_v57, 0.0  ;;  %p1480_p0 = scmp.ne.s32.totalorder %s1478_s18, %s1479_s20  ;;  %p1484_p3 = scmp.lt.s32.totalorder %s1478_s18, %s2111_s6 }
 0x17c   : > { %p1485_p5 = scmp.lt.s32.totalorder %s1483_s21, %s1479_s20 }
 0x17d   : > { %p1481_p9 = pnand %p1480_p0, %p1736_p7 }
 0x17e   : > { %p1486_p1 = por %p1485_p5, %p1484_p3 }
 0x17f   : > { %p1482_p13 = pneg %p1481_p9 }
 0x181   : > { %v882_v0 = vpop.permute.xlu1 %881  ;;  %p1487_p4 = pnand %p1486_p1, %p1482_p13 }
 0x182   : > { %v600_v2 = vld [vmem:[#allocation1 + $0x1] ss:$9 sm:$0xff]  ;;  %v883_v3 = vmul.u32 %v882_v0, %v879_v11 }
 0x183   : > { %v602_v4 = vsel %vm596_vm1, %v600_v2, %v595_v38 }
 0x184   : > { %v884_v5 = vadd.s32 %v883_v3, %v878_v63  ;;  %603 = vst [vmem:[%s380_s22] sm:$0x1] %v602_v4 }
 0x185   : > { %1490 = shalt.err (!%p1487_p4)
}
 0x186   : > { %1232 = dma.vmem_to_hbm [thread:$0]  (%p1736_p7), %s927_s24, 16, %s929_s14, %s2040_s17   ;;  %885 = vst [vmem:[%s394_s30] sm:$0xf] %v884_v5 }
 0x187   : > { %s901_s27 = scalar_lea.sflag [#allocation13], %s1781_s3  ;;  %s1505_s12 = sshra.s32 %s2036_s11, 4  ;;  %s1506_s12 = int_to_ptr.hbm [resolvable:$true] %s1505_s12 }
 0x188   : > { %s1507_s19 = scalar_lea.hbm %s1506_s12, 4  ;;  %s1511_s18 = scalar_lea.hbm %s2113_s8, 8 }
 0x189   : > { %p1508_p8 = scmp.ne.s32.totalorder %s1506_s12, %s1507_s19  ;;  %p1512_p2 = scmp.lt.s32.totalorder %s1506_s12, %s2113_s8 }
 0x18a   : > { %p1513_p12 = scmp.lt.s32.totalorder %s1511_s18, %s1507_s19 }
 0x18b   : > { %p1509_p10 = pnand %p1508_p8, %p1736_p7 }
 0x18c   : > { %p1514_p0 = por %p1513_p12, %p1512_p2 }
 0x18d   : > { %p1510_p11 = pneg %p1509_p10 }
 0x18f   : > { %p1515_p9 = pnand %p1514_p0, %p1510_p11 }
 0x191   : > { %1518 = shalt.err (!%p1515_p9)
}
 0x192   : > { %1234 = dma.vmem_to_hbm [thread:$0]  (%p1736_p7), %s2034_s16, 64, %s2036_s11, %s901_s27   ;;  %v793_v6 = vpop.f32.mrf.mxu1 }
 0x193   : > { %796 = vst [vmem:[%s1952_s26 + $0x4] sm:$0x3] %v793_v6  ;;  %s1219_s3 = sshll.u32 %s1688_s9, 3  ;;  %s940_s10 = sshll.u32 %s1952_s26, 4  ;;  %s941_s10 = int_to_ptr.vmem [resolvable:$true] %s940_s10 }
 0x194   : > { %s938_s30 = scalar_lea.hbm %s2112_s7, %s1219_s3  ;;  %s1539_s9 = scalar_lea.hbm %s2112_s7, 16 }
 0x195   : > { %s942_s21 = sshll.u32 %s938_s30, 4  ;;  %s943_s21 = int_to_ptr.hbm [resolvable:$true] %s942_s21 }
 0x196   : > { %s1533_s13 = sshra.s32 %s943_s21, 4  ;;  %s1534_s13 = int_to_ptr.hbm [resolvable:$true] %s1533_s13 }
 0x197   : > { %s1535_s29 = scalar_lea.hbm %s1534_s13, 8  ;;  %p1540_p1 = scmp.lt.s32.totalorder %s1534_s13, %s2112_s7 }
 0x198   : > { %p1536_p13 = scmp.ne.s32.totalorder %s1534_s13, %s1535_s29  ;;  %p1541_p4 = scmp.lt.s32.totalorder %s1539_s9, %s1535_s29 }
 0x19a   : > { %p1537_p3 = pnand %p1536_p13, %p1736_p7  ;;  %p1542_p8 = por %p1541_p4, %p1540_p1 }
 0x19c   : > { %p1538_p5 = pneg %p1537_p3 }
 0x19e   : > { %p1543_p10 = pnand %p1542_p8, %p1538_p5 }
 0x1ee   : > { %v854_v7 = vpop.f32.mrf.mxu3 }
 0x1ef   : > { %857 = vst [vmem:[%s1952_s26 + $0x6] sm:$0x3] %v854_v7 }
 0x1f0   : > { %1546 = shalt.err (!%p1543_p10)
}
 0x1f1   : > { %1233 = dma.vmem_to_hbm [thread:$0]  (%p1736_p7), %s941_s10, 128, %s943_s21, %s2040_s17  }
 0x1f2 PF: > { %s2145_s26 = sld [smem:[#allocation20_spill]] }
 0x1f3   : > { %s2147_s25 = sld [smem:[#allocation22_spill]] }
 0x1f8   : > { %s968_s22 = sand.u32 1, %s2145_s26  }
 0x1f9   : > { %p2148_p11 = scmp.ge.s32.totalorder %s2147_s25, 2  ;;  %s969_s18 = scalar_lea.sflag [#allocation4], %s968_s22 }
 0x1fb   : > { %p1251_p2 = pnand %p2148_p11, %p1704_p6 }
 0x1fd   : > { %p1252_p12 = pneg %p1251_p2 }
 0x1ff   : > { %1576 = dma.done.wait (%p1252_p12), %s969_s18, 32  }
 0x200   : > { %1578 = vsyncadd (%p1252_p12), %s969_s18, 4294967264  ;;  %s2149_s20 = sadd.s32 4294967294, %s2147_s25  }
 0x201   : > { %s978_s15 = sand.u32 1, %s2149_s20  }
 0x202   : > { %s979_s3 = scalar_lea.sflag [#allocation10], %s978_s15 }
 0x203   : > { %1580 = dma.done.wait (%p1252_p12), %s979_s3, 144  }
 0x204   : > { %1582 = vsyncadd (%p1252_p12), %s979_s3, 4294967152  ;;  %s998_s23 = scalar_lea.sflag [#allocation13], %s968_s22 }
 0x205   : > { %1584 = dma.done.wait (%p1252_p12), %s998_s23, 64  }
 0x206   : > { %1586 = vsyncadd (%p1252_p12), %s998_s23, 4294967232  ;;  %s2150_s30 = sld [smem:[#allocation24_spill]]  ;;  %s2153_s27 = smov %s1593_s28 }
 0x207   : > { %s2151_s17 = sld [smem:[#allocation21_spill]] }
 0x208   : > { %s2152_s29 = sld [smem:[#allocation25_spill]] }
 0x20c   : > { %p31_p7 = scmp.ge.s32.totalorder %s2150_s30, 4  }
 0x20d   : > { %s2154_s28 = smov %s2151_s17 }
 0x20e   :  { %33 = sbr.rel (!%p31_p7) target bundleno = 13 (0xd), region = 152 }
 0x213   :  { %1004 = vsyncpa [#allocation3], 1 }
 0x214   :  { %1006 = vsyncpa [#allocation3 + $0x1], 1 }
 0x215   :  { %1007 = vsyncpa [#allocation6], 1 }
 0x216   :  { %1009 = vsyncpa [#allocation6 + $0x1], 1 }
 0x217   :  { %1010 = vsyncpa [#allocation4], 1 }
 0x218   :  { %1012 = vsyncpa [#allocation4 + $0x1], 1 }
 0x219   :  { %1013 = vsyncpa [#allocation10], 1 }
 0x21a   :  { %1015 = vsyncpa [#allocation10 + $0x1], 1 }
 0x21b   :  { %1016 = vsyncpa [#allocation13], 1 }
 0x21c   :  { %1018 = vsyncpa [#allocation13 + $0x1], 1 }

</bundles_post_ra>
